<compile_context>
chip_gen: v7x
topology: tpu7x:2x2x1
jax: 0.10.0
libtpu: 0.0.40
codegen_flags: <defaults>
</compile_context>

<pallas_src>
import functools
import math

import jax
import jax.numpy as jnp
from jax.experimental import pallas as pl
from jax.experimental.pallas import tpu as pltpu


class ARGS:
    m = 16               # max words per tweet (rows kept from encoded outputs)
    n = 16               # must equal m (the module's math requires it, as in the original 200==200)
    d = 32               # word embedding dim (LSTM input size)
    hidden_lstm_dim = 32
    l = 32               # must equal hidden_lstm_dim (Ww @ W_dash), as in the original 80==80
    m_dash = 32
    T = 3                # conv kernel size
    k = 32               # conv out channels
    padd = 1


D_SCALE = math.sqrt(300.0)   # self.d = math.sqrt(300) is hard-coded in the torch module

OUT_LANES = 128              # lane-dense output slab width (only first 2 lanes are real logits)


# ------------------------- rotate-direction probe (run eagerly, outside jit) -------------------------

_ROLL_MATCHES_JNP = None


def _probe_roll_kernel(x_ref, o_ref):
    o_ref[...] = pltpu.roll(x_ref[...], shift=1, axis=0)


def probe_roll_direction():
    """Runs a tiny kernel once to pin down pltpu.roll's rotate direction (MANDATORY, call outside jit)."""
    global _ROLL_MATCHES_JNP
    x = jnp.tile(jnp.arange(8, dtype=jnp.float32)[:, None], (1, 128))
    out = pl.pallas_call(
        _probe_roll_kernel,
        out_shape=jax.ShapeDtypeStruct((8, 128), jnp.float32),
    )(x)
    _ROLL_MATCHES_JNP = bool(float(out[0, 0]) == 7.0)   # jnp.roll semantics: out[0] == x[-1] == 7
    return _ROLL_MATCHES_JNP


# ----------------------------------------- Pallas kernel -----------------------------------------

def _softmax(x, axis):
    # F.softmax default dim for 2-D torch inputs is dim=1.
    x = x - jnp.max(x, axis=axis, keepdims=True)
    e = jnp.exp(x)
    return e * pl.reciprocal(jnp.sum(e, axis=axis, keepdims=True), approx=True)


def postcom2dr_kernel(a_ref, hs_ref, e_ref,
                      w0_ref, w1_ref, wcww_ref, wct_ref, wwt_ref,
                      whv_ref, convw_ref, convb_ref, whp_ref, bias_ref,
                      out_ref, *, shift_prev, shift_next):
    f32 = jnp.float32
    bf16 = jnp.bfloat16
    TB, N, _ = a_ref.shape
    Hd = hs_ref.shape[2]
    Mw = e_ref.shape[1]
    MD = w0_ref.shape[1]
    Q = wct_ref.shape[1]          # == args.m == args.n
    K = convb_ref.shape[1]

    # MXU matmuls: bf16 operands, f32 accumulation.
    mm = lambda x, y: jnp.dot(x.astype(bf16), y.astype(bf16), preferred_element_type=f32)
    bmm = lambda eq, x, y: jnp.einsum(eq, x.astype(bf16), y.astype(bf16),
                                      preferred_element_type=f32)

    def vpu_bmm(w, x):
        # out[b, i, :] = sum_j w[b, i, j] * x[b, j, :]  -- 16-tap VPU broadcast-FMA (review item 9a)
        J = w.shape[2]
        acc = w[:, :, 0:1] * x[:, 0:1, :]
        for j in range(1, J):
            acc = acc + w[:, :, j:j + 1] * x[:, j:j + 1, :]
        return acc

    A = a_ref[...]                                   # (TB, N, N)
    Hs = hs_ref[...]                                 # (TB, N, Hd)  rows: [post, comments...]
    E = e_ref[...]                                   # (TB, Mw, Hd) first Mw per-word outputs (== W_dash^T)

    # node masks: node 0 is the post, nodes 1..N-1 the comments (masked instead of sliced).
    nid_row = jax.lax.broadcasted_iota(jnp.int32, (1, N), 1)
    nid_col = jax.lax.broadcasted_iota(jnp.int32, (N, 1), 0)
    keep_row = (nid_row > 0).astype(f32)             # (1, N)
    keep_col = (nid_col > 0).astype(f32)             # (N, 1)
    neg_row = jnp.where(nid_row == 0, f32(-1e30), f32(0.0))   # mask post key on the lane axis
    neg_col = jnp.where(nid_col == 0, f32(-1e30), f32(0.0))   # mask post key on the sublane axis

    # ---- two GCN-style propagation layers: tanh(A @ (X @ W)) ----
    t0 = mm(Hs.reshape(TB * N, Hd), w0_ref[...]).reshape(TB, N, MD)
    h1 = jnp.tanh(vpu_bmm(A, t0))                    # A-contraction on the VPU, not 16-deep MXU
    t1 = mm(h1.reshape(TB * N, MD), w1_ref[...]).reshape(TB, N, MD)
    h2 = jnp.tanh(vpu_bmm(A, t1))                    # (TB, N, MD); rows 1.. == Xc

    # ---- self-attention over comment nodes (post key masked out of the softmax) ----
    s = bmm('bnd,bjd->bnj', h2, h2) * f32(1.0 / D_SCALE) + neg_row
    attn = _softmax(s, axis=-1)                      # column 0 (post) is exactly 0 after the mask
    av = vpu_bmm(attn, h2)                           # (TB, N, MD); rows 1.. == Xc_attn^T == C^T

    # ---- co-attention ----
    e2 = E.reshape(TB * Mw, Hd)
    ew = mm(e2, wcww_ref[...])                       # fused E @ [Wcw^T | Ww^T]  -> (TB*Mw, MD+Q)
    ewcw = ew[:, :MD].reshape(TB, Mw, MD)            # (Wcw @ W_dash)^T per element
    eww = ew[:, MD:MD + Q].reshape(TB, Mw, Q)        # (Ww  @ W_dash)^T per element

    f_nm = jnp.tanh(bmm('bnd,bwd->bnw', av, ewcw))               # (TB, N, Mw)  == F   (rows = nodes)
    f_mn = jnp.tanh(bmm('bwd,bnd->bwn', ewcw, av)) * keep_row    # (TB, Mw, N)  == F^T, post column zeroed

    avwc = mm(av.reshape(TB * N, MD), wct_ref[...]).reshape(TB, N, Q)       # (Wc @ C)^T
    fe = vpu_bmm(f_nm, E)                                                    # (W_dash @ F^T)^T
    feww = mm(fe.reshape(TB * N, Hd), wwt_ref[...]).reshape(TB, N, Q)       # (Ww @ W_dash @ F^T)^T
    hw_t = jnp.tanh(avwc + feww)                                             # (TB, N, Q)   == Hw^T
    wccf_t = vpu_bmm(f_mn, avwc)                                             # (Wc @ C @ F)^T
    hc_t = jnp.tanh(eww + wccf_t)                                            # (TB, Mw, Q)  == Hc^T

    # ---- ac / aw logits: VPU multiply + lane reduce (no broadcasts, no 1-wide matmuls) ----
    whv = whv_ref[...]                                           # (2, Q): rows [Whw^T, Whc^T]
    whw_vec = whv[0:1, :].reshape(1, 1, Q)
    whc_vec = whv[1:2, :].reshape(1, 1, Q)
    la = jnp.sum(hw_t * whw_vec, axis=-1, keepdims=True) + neg_col   # (TB, N, 1)
    lw = jnp.sum(hc_t * whc_vec, axis=-1, keepdims=True)             # (TB, Mw, 1)
    ac = _softmax(la, axis=1)                                        # softmax over nodes (sublane axis)
    aw = _softmax(lw, axis=1)                                        # softmax over words

    # ---- w_bar / c_bar ----
    w_bar = jnp.sum(aw * E, axis=1, keepdims=True).reshape(TB, Hd)   # (TB, Hd)
    # bug-for-bug with the torch loop ('=' not '+='): only the LAST comment column survives
    c_bar = (ac[:, N - 1:N, :] * av[:, N - 1:N, :]).reshape(TB, MD)  # (TB, MD)

    # ---- Conv1d(Hd -> k, T=3, pad=1) over comment hidden states, ReLU, global max-pool ----
    # post rows are zeroed, so roll wrap-around across element boundaries acts as the zero padding.
    hm = (Hs * keep_col).reshape(TB * N, Hd)
    h_prev = pltpu.roll(hm, shift=shift_prev, axis=0)    # row r -> hidden of comment r-1 (0 at edges)
    h_next = pltpu.roll(hm, shift=shift_next, axis=0)    # row r -> hidden of comment r+1 (0 at edges)
    conv_in = jnp.concatenate([h_prev, hm, h_next], axis=1)          # (TB*N, 3*Hd)
    conv = mm(conv_in, convw_ref[...]) + convb_ref[...]              # single 96-deep tap-fused matmul
    all_local = jnp.maximum(conv, 0.0).reshape(TB, N, K) * keep_col  # post row excluded (relu >= 0)
    h_local = jnp.max(all_local, axis=1, keepdims=True).reshape(TB, K)

    # ---- final linear: one lane-dense flat matmul against the zero-padded (96, 128) weight slab ----
    feats = jnp.concatenate([w_bar, c_bar, h_local], axis=1)         # (TB, Hd+MD+K)
    out_ref[...] = mm(feats, whp_ref[...]) + bias_ref[...]           # (TB, 128); lanes >= 2 are zero


def run_postcom2dr(adj, hidden_states, encoded_m, params, tb=32):
    """params: (W0, W1, Wcw, Ww, Wc, Whw, Whc, Wh, bh, conv_w, conv_b) in torch orientation."""
    (W0, W1, Wcw, Ww, Wc, Whw, Whc, Wh, bh, conv_w, conv_b) = params
    B, N, _ = adj.shape
    Hd = hidden_states.shape[-1]
    Mw = encoded_m.shape[1]
    MD = W0.shape[1]
    K = conv_w.shape[0]
    f32, bf16 = jnp.float32, jnp.bfloat16

    if _ROLL_MATCHES_JNP is None:
        raise RuntimeError("call probe_roll_direction() once (outside jit) before run_postcom2dr()")

    # one-time parameter prep: consolidation, pre-transposition, bf16 cast for MXU-side weights.
    w0 = W0.astype(bf16)                                                 # (Hd, MD)
    w1 = W1.astype(bf16)                                                 # (MD, MD)
    wcww = jnp.concatenate([Wcw.T, Ww.T], axis=1).astype(bf16)           # (Hd, MD+Q)  fused E weights
    wct = Wc.T.astype(bf16)                                              # (MD, Q)
    wwt = Ww.T.astype(bf16)                                              # (Hd, Q)
    whv = jnp.concatenate([Whw.T, Whc.T], axis=0).astype(f32)            # (2, Q)      VPU side -> f32
    convw = jnp.concatenate([conv_w[:, :, 0].T, conv_w[:, :, 1].T, conv_w[:, :, 2].T],
                            axis=0).astype(bf16)                         # (3*Hd, K)   tap-fused
    convb = conv_b.reshape(1, K).astype(f32)
    whp = jnp.zeros((Hd + MD + K, OUT_LANES), f32).at[:, :2].set(Wh.T).astype(bf16)  # (96, 128)
    bias = jnp.zeros((1, OUT_LANES), f32).at[:, :2].set(bh.reshape(1, 2))            # (1, 128)

    tb = int(max(8, min(tb, 512)))
    bp = -(-B // tb) * tb
    if bp != B:
        pad = bp - B
        adj = jnp.concatenate([adj, jnp.zeros((pad, N, N), adj.dtype)], axis=0)
        hidden_states = jnp.concatenate(
            [hidden_states, jnp.zeros((pad, N, Hd), hidden_states.dtype)], axis=0)
        encoded_m = jnp.concatenate(
            [encoded_m, jnp.zeros((pad, Mw, Hd), encoded_m.dtype)], axis=0)

    tbn = tb * N
    shift_prev = 1 if _ROLL_MATCHES_JNP else tbn - 1     # row r <- row r-1
    shift_next = tbn - 1 if _ROLL_MATCHES_JNP else 1     # row r <- row r+1

    param_arrays = (w0, w1, wcww, wct, wwt, whv, convw, convb, whp, bias)

    def _const_spec(p):
        nd = p.ndim
        return pl.BlockSpec(p.shape, lambda g, _nd=nd: (0,) * _nd)

    in_specs = [
        pl.BlockSpec((tb, N, N), lambda g: (g, 0, 0)),
        pl.BlockSpec((tb, N, Hd), lambda g: (g, 0, 0)),
        pl.BlockSpec((tb, Mw, Hd), lambda g: (g, 0, 0)),
    ] + [_const_spec(p) for p in param_arrays]

    # explicit scoped-VMEM budget (review): double-buffered blocks + params + ~"tens of KB"/element,
    # with headroom; keep tb <= ~256 on v7x (64 MiB physical VMEM).
    vmem_bytes = int(min(96 * 2**20, 16 * 2**20 + tb * 96 * 1024))

    out = pl.pallas_call(
        functools.partial(postcom2dr_kernel, shift_prev=shift_prev, shift_next=shift_next),
        out_shape=jax.ShapeDtypeStruct((bp, OUT_LANES), f32),
        grid=(bp // tb,),
        in_specs=in_specs,
        out_specs=pl.BlockSpec((tb, OUT_LANES), lambda g: (g, 0)),
        compiler_params=pltpu.CompilerParams(
            dimension_semantics=("parallel",),
            vmem_limit_bytes=vmem_bytes),
    )(adj.astype(f32), hidden_states.astype(f32), encoded_m.astype(f32), *param_arrays)

    # torch: stack of (1,2) rows -> (B,1,2) -> .squeeze()  (== (B,2) for B > 1)
    return out[:B, :2]


# ------------- plain-JAX glue: LSTM feature extraction (get_lstm_encoded_data) -------------

def lstm_seq(x, p):
    W_ih, W_hh, b_ih, b_hh = p           # PyTorch LSTM layout: gates ordered (i, f, g, o)
    Hn = W_hh.shape[1]

    def step(carry, xt):
        h, c = carry
        gates = W_ih @ xt + b_ih + W_hh @ h + b_hh
        i, f, g, o = jnp.split(gates, 4)
        c_new = jax.nn.sigmoid(f) * c + jax.nn.sigmoid(i) * jnp.tanh(g)
        h_new = jax.nn.sigmoid(o) * jnp.tanh(c_new)
        return (h_new, c_new), h_new

    init = (jnp.zeros((Hn,), x.dtype), jnp.zeros((Hn,), x.dtype))
    (h_T, _), outs = jax.lax.scan(step, init, x)
    return outs, h_T


def get_lstm_encoded(embedded, post_p, comment_p):
    B, Nseq, Lseq, _ = embedded.shape
    post_out, post_h = jax.vmap(lambda s: lstm_seq(s, post_p))(embedded[:, 0])
    com_out, com_h = jax.vmap(jax.vmap(lambda s: lstm_seq(s, comment_p)))(embedded[:, 1:])
    encoded = jnp.concatenate([post_out[:, None], com_out], axis=1)
    encoded = encoded.reshape(B, Nseq * Lseq, -1)
    hidden = jnp.concatenate([post_h[:, None], com_h], axis=1)
    return encoded, hidden


def postcom2dr_forward(embedded, adj, post_p, comment_p, params):
    encoded, hidden = get_lstm_encoded(embedded, post_p, comment_p)
    E = encoded[:, :ARGS.m]
    return run_postcom2dr(adj, hidden, E, params)


# ----------------------- pure-JAX reference (straight mirror of the torch math) -----------------------

def postcom2dr_ref(adj, hidden_states, encoded_m, params):
    p32 = [p.astype(jnp.float32) for p in params]
    (W0, W1, Wcw, Ww, Wc, Whw, Whc, Wh, bh, conv_w, conv_b) = p32

    def one(A, Hs, Em):
        H1 = jnp.tanh(A @ (Hs @ W0))
        H2 = jnp.tanh(A @ (H1 @ W1))
        Xc = H2[1:]
        attn = jax.nn.softmax((Xc @ Xc.T) / D_SCALE, axis=1)
        C = (attn @ Xc).T                      # (m_dash, N-1)
        W_dash = Em.T                          # (Hd, m)
        F = jnp.tanh(C.T @ (Wcw @ W_dash))     # (N-1, m)
        Hc = jnp.tanh(Ww @ W_dash + Wc @ (C @ F))
        Hw = jnp.tanh(Wc @ C + Ww @ (W_dash @ F.T))
        ac = jax.nn.softmax(Whw.T @ Hw, axis=1)
        aw = jax.nn.softmax(Whc.T @ Hc, axis=1)
        w_bar = (aw @ Em)[0]                   # (Hd,)
        c_bar = ac[0, -1] * C[:, -1]           # (m_dash,)  ('=' bug: only last column kept)
        X = Hs[1:].T                           # (Hd, L)
        L = X.shape[1]
        Xp = jnp.pad(X, ((0, 0), (1, 1)))
        conv = sum(conv_w[:, :, t] @ Xp[:, t:t + L] for t in range(conv_w.shape[2]))
        conv = conv + conv_b[:, None]
        h_local = jnp.max(jnp.maximum(conv, 0.0), axis=1)   # (k,)
        h_en = jnp.concatenate([w_bar, c_bar, h_local])[None, :]
        return (Wh @ h_en.T + bh).T[0]

    return jax.vmap(one)(adj.astype(jnp.float32), hidden_states.astype(jnp.float32),
                         encoded_m.astype(jnp.float32))


if __name__ == "__main__":
    a = ARGS
    B, Nseq, Lseq = 4, 16, 2          # 1 post + 15 comments, 2 tokens each (Nseq*Lseq >= m)
    Hd = a.hidden_lstm_dim

    key = jax.random.PRNGKey(0)
    ks = jax.random.split(key, 24)

    def rnd(k, shape, scale=0.1):
        return scale * jax.random.normal(k, shape, dtype=jnp.float32)

    # Module parameters (torch init is all-ones; small random values keep tanh/softmax unsaturated).
    W0 = rnd(ks[0], (Hd, a.m_dash))
    W1 = rnd(ks[1], (a.m_dash, a.m_dash))
    Wcw = rnd(ks[2], (a.m_dash, Hd))
    Ww = rnd(ks[3], (a.m, a.l))
    Wc = rnd(ks[4], (a.n, a.m_dash))
    Whw = rnd(ks[5], (a.m, 1))
    Whc = rnd(ks[6], (a.n, 1))
    Wh = rnd(ks[7], (2, a.hidden_lstm_dim + a.m_dash + a.k))
    bh = rnd(ks[8], (2, 1))
    conv_w = rnd(ks[9], (a.k, Hd, a.T))     # Conv1d weight (out, in, T)
    conv_b = rnd(ks[10], (a.k,))
    params = (W0, W1, Wcw, Ww, Wc, Whw, Whc, Wh, bh, conv_w, conv_b)

    # LSTM parameters (PyTorch shapes: weight_ih (4H, d), weight_hh (4H, H), biases (4H,))
    post_p = (rnd(ks[11], (4 * Hd, a.d)), rnd(ks[12], (4 * Hd, Hd)),
              rnd(ks[13], (4 * Hd,)), rnd(ks[14], (4 * Hd,)))
    comment_p = (rnd(ks[15], (4 * Hd, a.d)), rnd(ks[16], (4 * Hd, Hd)),
                 rnd(ks[17], (4 * Hd,)), rnd(ks[18], (4 * Hd,)))

    # Inputs corresponding to data_row['embedded_data'] and data_row['adj']
    embedded = jax.random.normal(ks[19], (B, Nseq, Lseq, a.d), dtype=jnp.float32)
    adj = (jax.random.uniform(ks[20], (B, Nseq, Nseq)) < 0.3).astype(jnp.float32)
    adj = adj + jnp.eye(Nseq, dtype=jnp.float32)[None]

    probe_roll_direction()               # mandatory: pins down pltpu.roll direction (eager, outside jit)

    fwd = jax.jit(postcom2dr_forward)
    out = fwd(embedded, adj, post_p, comment_p, params)
    jax.block_until_ready(out)
    assert out.shape == (B, 2), out.shape

    # tolerance-checked pure-JAX f32 reference; 2e-2 tolerance accommodates bf16 MXU operands
    # (f32 accumulation) on top of the f32-vs-f64 gap and the approx softmax reciprocal.
    encoded, hidden = get_lstm_encoded(embedded, post_p, comment_p)
    ref = postcom2dr_ref(adj, hidden, encoded[:, :a.m], params)
    assert jnp.allclose(out, ref, rtol=2e-2, atol=2e-2), (out, ref)

    print("KERNEL_OK")
</pallas_src>

<mosaic_0001>
module attributes {stable_mosaic.version = 11 : i64} {
  func.func @_probe_roll_kernel(%arg0: memref<8x128xf32, #tpu.memory_space<vmem>>, %arg1: memref<8x128xf32, #tpu.memory_space<vmem>>) attributes {dimension_semantics = [], scalar_prefetch = 0 : i64, scratch_operands = 0 : i64, tpu.core_type = #tpu.core_type<tc>} {
    %c0 = arith.constant 0 : index
    %c0_0 = arith.constant 0 : index
    %0 = vector.load %arg0[%c0, %c0_0] : memref<8x128xf32, #tpu.memory_space<vmem>>, vector<8x128xf32>
    %c1_i32 = arith.constant 1 : i32
    %1 = tpu.dynamic_rotate %0 by %c1_i32 dim 0 : vector<8x128xf32>, i32 -> vector<8x128xf32>
    %c0_1 = arith.constant 0 : index
    %c0_2 = arith.constant 0 : index
    %2 = vector.load %arg1[%c0_1, %c0_2] : memref<8x128xf32, #tpu.memory_space<vmem>>, vector<8x128xf32>
    tpu.vector_store %arg1[%c0_1, %c0_2], %1 {strides = array<i32>} : memref<8x128xf32, #tpu.memory_space<vmem>>, vector<8x128xf32>,
    return
  }
}

</mosaic_0001>

<bundles_post_ra>
// kernel: tpu_custom_call.1
= control target key start
LH: loop header
LB: loop body
LE: loop exit
PB: predicated region body
PF: predicated region fallthrough
CT: control target
= control target key end

     0   :  { %6 = vsyncpa [#allocation3], 0  ;;  %s125_s0 = inlined_call_operand.hbm [shape: f32[8,128], index: 0, kind: input, shape index: {}]   ;;  %s126_s1 = inlined_call_operand.hbm [shape: f32[8,128], index: 1, kind: output, shape index: {}]  }
   0x1   :  { %7 = vsyncpa [#allocation4], 0  ;;  %s89_s6 = smov [#allocation2]   ;;  %s41_s10 = scalar_lea.hbm %s125_s0, 128 }
   0x2   :  { %s14_s7 = sshll.u32 %s89_s6, 4  ;;  %p42_p0 = scmp.ne.s32.totalorder %s125_s0, %s41_s10  ;;  %s15_s7 = int_to_ptr.vmem [resolvable:$true] %s14_s7 }
   0x3   :  { %p45_p1 = scmp.lt.u32.totalorder %s41_s10, %s125_s0 }
   0x5   :  { %p47_p2 = pnand %p45_p1, %p42_p0 }
   0x7   :  { %50 = shalt.err (!%p47_p2)
}
   0x8   :  { %s51_s15 = scalar_lea.vmem %s15_s7, 128  ;;  %p56_p4 = scmp.lt.s32.totalorder %s15_s7, %s15_s7 }
   0x9   :  { %p52_p3 = scmp.ne.s32.totalorder %s15_s7, %s51_s15  ;;  %p57_p5 = scmp.lt.s32.totalorder %s51_s15, %s51_s15 }
   0xb   :  { %p58_p6 = por %p57_p5, %p56_p4 }
   0xd   :  { %p59_p7 = pnand %p58_p6, %p52_p3 }
   0xf   :  { %62 = shalt.err (!%p59_p7)
}
  0x10   :  { %17 = dma.hbm_to_vmem [thread:$0]  %s125_s0, 128, %s15_s7, [#allocation3]  }
  0x11   :  { %85 = dma.done.wait [#allocation3], 128  }
  0x12   :  { %86 = vsyncadd [#allocation3], 4294967168  ;;  %s90_s18 = smov [#allocation5]   ;;  %v21_v0 = vld [vmem:[#allocation2] sm:$0xff] }
  0x13   :  { %s30_s19 = sshll.u32 %s90_s18, 4  ;;  %v22_v1 = vrot.slane %v21_v0, 7  ;;  %s31_s19 = int_to_ptr.vmem [resolvable:$true] %s30_s19 }
  0x14   :  { %s63_s20 = scalar_lea.vmem %s31_s19, 128  ;;  %p68_p9 = scmp.lt.s32.totalorder %s31_s19, %s31_s19 }
  0x15   :  { %23 = vst [vmem:[#allocation5] sm:$0xff] %v22_v1  ;;  %p64_p8 = scmp.ne.s32.totalorder %s31_s19, %s63_s20  ;;  %p69_p10 = scmp.lt.s32.totalorder %s63_s20, %s63_s20 }
  0x17   :  { %p70_p11 = por %p69_p10, %p68_p9 }
  0x19   :  { %p71_p12 = pnand %p70_p11, %p64_p8 }
  0x1b   :  { %74 = shalt.err (!%p71_p12)
}
  0x1c   :  { %s75_s23 = scalar_lea.hbm %s126_s1, 128 }
  0x1d   :  { %p76_p13 = scmp.ne.s32.totalorder %s126_s1, %s75_s23  ;;  %p79_p0 = scmp.lt.u32.totalorder %s75_s23, %s126_s1 }
  0x1f   :  { %p81_p1 = pnand %p79_p0, %p76_p13 }
  0x21   :  { %84 = shalt.err (!%p81_p1)
}
  0x22   :  { %33 = dma.vmem_to_hbm [thread:$0]  %s31_s19, 128, %s126_s1, [#allocation4]  }
  0x23   :  { %87 = dma.done.wait [#allocation4], 128  }
  0x24   :  { %88 = vsyncadd [#allocation4], 4294967168 }
  0x25   :  { %37 = vsyncpa [#allocation3], 1 }
  0x26   :  { %38 = vsyncpa [#allocation4], 1 }

</bundles_post_ra>
